<compile_context>
chip_gen: v7x
topology: tpu7x:2x2x1
jax: 0.10.0
libtpu: 0.0.40
codegen_flags: <defaults>
</compile_context>

<pallas_src>
import jax
import jax.numpy as jnp
from jax.experimental import pallas as pl
from jax.experimental.pallas import tpu as pltpu


LANE = 128
# Per-block byte budget for the image tile.  Pallas double-buffers input and
# output, so resident VMEM ~= 4 * TARGET_BLOCK_BYTES (~8 MiB) + tiny bias.
TARGET_BLOCK_BYTES = 2 << 20


def meanshift_kernel(x_ref, b_ref, o_ref):
    # x_ref: (R, BC) tile of the flattened image, b_ref: (R, 1) per-row bias.
    # Identity 1x1 conv + bias == elementwise add with lane broadcast (VPU only).
    o_ref[...] = x_ref[...] + b_ref[...]


def _round_up(v, m):
    return (v + m - 1) // m * m


def _pick_lane_tile(R, L, itemsize):
    """VMEM-budgeted lane-tile width for the (R, L) flattened view."""
    if R * L * itemsize <= TARGET_BLOCK_BYTES:
        # Whole image fits in one modest block: single grid step, no raggedness.
        return L
    # Width that keeps one block ~TARGET_BLOCK_BYTES, multiple of 128, >= 2048.
    bc = max((TARGET_BLOCK_BYTES // (R * itemsize)) // LANE * LANE, 2048)
    # Keep at least 4 grid steps so both v7x TensorCores get work under
    # dimension_semantics=("parallel",).
    bc_four_steps = max(_round_up(pl.cdiv(L, 4), LANE), 2048)
    # Never exceed the (lane-rounded) full extent.
    return min(bc, bc_four_steps, _round_up(L, LANE))


def mean_shift(x_nchw, bias):
    """Apply MeanShift (frozen identity 1x1 conv + bias) to an NCHW tensor."""
    N, C, H, W = x_nchw.shape
    R = N * C          # row axis: one row per (image, channel) plane
    L = H * W          # lane axis: all spatial positions of that plane
    itemsize = jnp.dtype(x_nchw.dtype).itemsize

    # Contiguous reshape (no transpose, no extra HBM traffic).
    x2d = x_nchw.reshape(R, L)

    # Per-row bias: bias[row % C], shape (R, 1) so it broadcasts along lanes.
    bias_rows = jnp.tile(bias.astype(x_nchw.dtype), N).reshape(R, 1)

    BC = _pick_lane_tile(R, L, itemsize)
    grid = (pl.cdiv(L, BC),)

    # Memory-bound: 1 add per element, read + write of the full tensor.
    cost = pl.CostEstimate(
        flops=R * L,
        transcendentals=0,
        bytes_accessed=2 * R * L * itemsize + R * itemsize,
    )

    out2d = pl.pallas_call(
        meanshift_kernel,
        out_shape=jax.ShapeDtypeStruct((R, L), x_nchw.dtype),
        grid=grid,
        in_specs=[
            # Image tile: full row extent, BC lane columns per grid step.
            pl.BlockSpec((R, BC), lambda j: (0, j)),
            # Bias column: same tiny block every step (kept resident).
            pl.BlockSpec((R, 1), lambda j: (0, 0)),
        ],
        out_specs=pl.BlockSpec((R, BC), lambda j: (0, j)),
        compiler_params=pltpu.CompilerParams(
            # Blocks are independent -> shard across TCs on v7x; harmless elsewhere.
            dimension_semantics=("parallel",),
        ),
        cost_estimate=cost,
    )(x2d, bias_rows)

    return out2d.reshape(N, C, H, W)


def make_meanshift_params(mean_rgb, sub):
    """Deterministic parameter setup mirroring MeanShift.__init__."""
    sign = -1.0 if sub else 1.0
    # Conv2d weight is torch.eye(3).view(3,3,1,1): identity -> the conv reduces
    # to a per-channel bias add, which is what the kernel implements directly.
    bias = jnp.array([mean_rgb[0] * sign,
                      mean_rgb[1] * sign,
                      mean_rgb[2] * sign], dtype=jnp.float32)
    return bias


if __name__ == "__main__":
    key = jax.random.PRNGKey(0)
    mean_rgb = (0.4488 * 255.0, 0.4371 * 255.0, 0.4040 * 255.0)
    bias = make_meanshift_params(mean_rgb, sub=True)

    ok = True

    # Small shape (single-block path).  MeanShift is hard-wired to 3 channels.
    k0, k1 = jax.random.split(key)
    x_small = jax.random.uniform(k0, (2, 3, 16, 16), dtype=jnp.float32) * 255.0
    out_small = jax.block_until_ready(mean_shift(x_small, bias))
    ref_small = x_small + bias[None, :, None, None]
    ok &= bool(out_small.shape == x_small.shape)
    ok &= bool(jnp.allclose(out_small, ref_small, atol=1e-5))

    # Larger shape: exercises the VMEM-budgeted multi-step grid (4 steps),
    # the >=4-step cap for v7x megacore sharding, and a ragged last lane tile.
    x_big = jax.random.uniform(k1, (2, 3, 250, 390), dtype=jnp.float32) * 255.0
    out_big = jax.block_until_ready(mean_shift(x_big, bias))
    ref_big = x_big + bias[None, :, None, None]
    ok &= bool(out_big.shape == x_big.shape)
    ok &= bool(jnp.allclose(out_big, ref_big, atol=1e-5))

    assert ok, "mismatch vs reference"
    print("KERNEL_OK")
</pallas_src>

<mosaic_0001>
module attributes {stable_mosaic.version = 11 : i64} {
  func.func @meanshift_kernel(%arg0: i32, %arg1: memref<6x256xf32, #tpu.memory_space<vmem>>, %arg2: memref<6x1xf32, #tpu.memory_space<vmem>>, %arg3: memref<6x256xf32, #tpu.memory_space<vmem>>) attributes {dimension_semantics = [#tpu.dimension_semantics<parallel>], iteration_bounds = array<i64: 1>, scalar_prefetch = 0 : i64, scratch_operands = 0 : i64, tpu.core_type = #tpu.core_type<tc>, window_params = [{transform_indices = @transform_0, window_bounds = array<i64: 6, 256>}, {pipeline_mode = #tpu.pipeline_mode<synchronous>, transform_indices = @transform_1, window_bounds = array<i64: 6, 1>}, {transform_indices = @transform_2, window_bounds = array<i64: 6, 256>}]} {
    %c0 = arith.constant 0 : index
    %c0_0 = arith.constant 0 : index
    %0 = vector.load %arg1[%c0, %c0_0] : memref<6x256xf32, #tpu.memory_space<vmem>>, vector<6x256xf32>
    %c0_1 = arith.constant 0 : index
    %c0_2 = arith.constant 0 : index
    %1 = vector.load %arg2[%c0_1, %c0_2] : memref<6x1xf32, #tpu.memory_space<vmem>>, vector<6x1xf32>
    %2 = vector.broadcast %1 : vector<6x1xf32> to vector<6x256xf32>
    %3 = arith.addf %0, %2 : vector<6x256xf32>
    %c0_3 = arith.constant 0 : index
    %c0_4 = arith.constant 0 : index
    %4 = vector.load %arg3[%c0_3, %c0_4] : memref<6x256xf32, #tpu.memory_space<vmem>>, vector<6x256xf32>
    tpu.vector_store %arg3[%c0_3, %c0_4], %3 {strides = array<i32>} : memref<6x256xf32, #tpu.memory_space<vmem>>, vector<6x256xf32>,
    return
  }
  func.func @transform_0(%arg0: i32) -> (i32, i32) {
    %c0_i32 = arith.constant 0 : i32
    %c0_i32_0 = arith.constant 0 : i32
    return %c0_i32, %arg0 : i32, i32
  }
  func.func @transform_1(%arg0: i32) -> (i32, i32) {
    %c0_i32 = arith.constant 0 : i32
    %c0_i32_0 = arith.constant 0 : i32
    %c0_i32_1 = arith.constant 0 : i32
    return %c0_i32, %c0_i32_0 : i32, i32
  }
  func.func @transform_2(%arg0: i32) -> (i32, i32) {
    %c0_i32 = arith.constant 0 : i32
    %c0_i32_0 = arith.constant 0 : i32
    return %c0_i32, %arg0 : i32, i32
  }
}

</mosaic_0001>

<bundles_post_ra>
// kernel: tpu_custom_call.1
= control target key start
LH: loop header
LB: loop body
LE: loop exit
PB: predicated region body
PF: predicated region fallthrough
CT: control target
= control target key end

     0   :  { %7 = vsyncpa [#allocation3], 0  ;;  %s148_s0 = inlined_call_operand.hbm [shape: f32[6,256], index: 0, kind: input, shape index: {}]   ;;  %s149_s1 = inlined_call_operand.vmem [shape: f32[6,1], index: 1, kind: input, shape index: {}]   ;;  %s150_s2 = inlined_call_operand.hbm [shape: f32[6,256], index: 2, kind: output, shape index: {}]  }
   0x1   :  { %8 = vsyncpa [#allocation4], 0  ;;  %s103_s9 = smov [#allocation2]   ;;  %s55_s13 = scalar_lea.hbm %s148_s0, 256 }
   0x2   :  { %s15_s10 = sshll.u32 %s103_s9, 4  ;;  %p56_p0 = scmp.ne.s32.totalorder %s148_s0, %s55_s13  ;;  %s16_s10 = int_to_ptr.vmem [resolvable:$true] %s15_s10 }
   0x3   :  { %p59_p1 = scmp.lt.u32.totalorder %s55_s13, %s148_s0 }
   0x5   :  { %p61_p2 = pnand %p59_p1, %p56_p0 }
   0x7   :  { %64 = shalt.err (!%p61_p2)
}
   0x8   :  { %s65_s18 = scalar_lea.vmem %s16_s10, 256  ;;  %p70_p4 = scmp.lt.s32.totalorder %s16_s10, %s16_s10 }
   0x9   :  { %p66_p3 = scmp.ne.s32.totalorder %s16_s10, %s65_s18  ;;  %p71_p5 = scmp.lt.s32.totalorder %s65_s18, %s65_s18 }
   0xb   :  { %p72_p6 = por %p71_p5, %p70_p4 }
   0xd   :  { %p73_p7 = pnand %p72_p6, %p66_p3 }
   0xf   :  { %76 = shalt.err (!%p73_p7)
}
  0x10   :  { %18 = dma.hbm_to_vmem [thread:$0]  %s148_s0, 256, %s16_s10, [#allocation3]  }
  0x11   :  { %99 = dma.done.wait [#allocation3], 256  }
  0x12   :  { %100 = vsyncadd [#allocation3], 4294967040  ;;  %v104_v0 = vmov 0   ;;  %v26_v1 = vld [vmem:[%s149_s1] sm:$0x3f]  ;;  %s105_s23 = smov [#allocation5]  }
  0x13   :  { %54 = vset.pattern.permute.xlu0 %v104_v0  ;;  %v24_v2 = vld [vmem:[#allocation2] sm:$0x3f]  ;;  %v25_v3 = vld [vmem:[#allocation2 + $0x8] sm:$0x3f]  ;;  %s42_s24 = sshll.u32 %s105_s23, 4  ;;  %s43_s24 = int_to_ptr.vmem [resolvable:$true] %s42_s24 }
  0x14   :  { %29 = vperm.xlu0 %54, %v26_v1   ;;  %s77_s0 = scalar_lea.vmem %s43_s24, 256  ;;  %p82_p9 = scmp.lt.s32.totalorder %s43_s24, %s43_s24 }
  0x15   :  { %p78_p8 = scmp.ne.s32.totalorder %s43_s24, %s77_s0  ;;  %p83_p10 = scmp.lt.s32.totalorder %s77_s0, %s77_s0 }
  0x17   :  { %p84_p11 = por %p83_p10, %p82_p9 }
  0x19   :  { %p85_p12 = pnand %p84_p11, %p78_p8 }
  0x93   :  { %v30_v4 = vpop.permute.xlu0 %29 }
  0x94   :  { %v32_v5 = vadd.f32 %v30_v4, %v24_v2  ;;  %v33_v6 = vadd.f32 %v30_v4, %v25_v3 }
  0x96   :  { %34 = vst [vmem:[#allocation5] sm:$0x3f] %v32_v5  ;;  %35 = vst [vmem:[#allocation5 + $0x8] sm:$0x3f] %v33_v6 }
  0x97   :  { %88 = shalt.err (!%p85_p12)
}
  0x98   :  { %s89_s26 = scalar_lea.hbm %s150_s2, 256 }
  0x99   :  { %p90_p13 = scmp.ne.s32.totalorder %s150_s2, %s89_s26  ;;  %p93_p0 = scmp.lt.u32.totalorder %s89_s26, %s150_s2 }
  0x9b   :  { %p95_p1 = pnand %p93_p0, %p90_p13 }
  0x9d   :  { %98 = shalt.err (!%p95_p1)
}
  0x9e   :  { %45 = dma.vmem_to_hbm [thread:$0]  %s43_s24, 256, %s150_s2, [#allocation4]  }
  0x9f   :  { %101 = dma.done.wait [#allocation4], 256  }
  0xa0   :  { %102 = vsyncadd [#allocation4], 4294967040 }
  0xa1   :  { %49 = vsyncpa [#allocation3], 1 }
  0xa2   :  { %50 = vsyncpa [#allocation4], 1 }

</bundles_post_ra>
